<compile_context>
chip_gen: v5e
topology: v5e:2x2
jax: 0.10.0
libtpu: 0.0.40
codegen_flags: <defaults>
</compile_context>

<pallas_src>
import jax
import jax.numpy as jnp
from jax import lax
from jax.experimental import pallas as pl
from jax.experimental.pallas import tpu as pltpu

VOCAB = 50
EMBED = 32       # embedding_size
HIDDEN = 32      # hidden_size
FINAL_STATE_ONLY = False

# Packed parameter-slab layout (f32, 4*HIDDEN = 128 lanes wide). All row
# starts are multiples of 8 sublanes so static slices stay tile-aligned.
_G = 4 * HIDDEN
_ROW_FUSED = 0                       # [VOCAB, 4H]  emb @ W_ih (row 0 == 0)
_ROW_WHH = 56                        # [H, 4H]      W_hh
_ROW_BIAS = 88                       # [1, 4H]      b_ih + b_hh
_ROW_WE2D = 96                       # [H, 4H]      encoder2decoder W.T in lanes [:H]
_ROW_BE2D = 128                      # [1, 4H]      encoder2decoder bias in lanes [:H]
_SLAB_ROWS = 136


def _lang_encoder_kernel(instr_ref, slab_ref, out_ref):
    """Single-invocation kernel (no grid); everything resident in VMEM.

    instr_ref : [B, S]            int32 token ids (0 = trailing padding)
    slab_ref  : [_SLAB_ROWS, 4H]  packed f32 parameter slab (layout above)
    out_ref   : [B, (S+4)*H]      lane-dense output slab:
                  [:, :S*H]              padded LSTM outputs (batch-major)
                  [:, S*H     : S*H+H]   final hidden state hidden[0][-1]
                  [:, S*H+H   : S*H+2H]  final cell state   hidden[1][-1]
                  [:, S*H+2H  : S*H+3H]  tanh(encoder2decoder(hidden[0][-1]))
                  [:, S*H+3H  :]         zero padding (keeps width = 3*128)
    """
    B, S = instr_ref.shape
    V = VOCAB
    H = HIDDEN
    G = _G

    tok = instr_ref[...]                                             # [B,S] i32
    # lengths = (instruction != 0).sum(1); dropout(p=0, eval) -> identity.
    lengths = jnp.sum((tok != 0).astype(jnp.float32), axis=1,
                      keepdims=True)                                 # [B,1]

    # Time-major token column (row = t*B + b) built from per-step lane slices,
    # then ONE fused embedding->gate-projection matmul: the slab already holds
    # emb @ W_ih, so one-hot @ fused + bias yields the per-token input
    # contribution to all four gates (padding token 0 hits the zero row).
    tok_tm = jnp.concatenate([tok[:, t:t + 1] for t in range(S)], axis=0)
    onehot = (lax.broadcasted_iota(jnp.int32, (S * B, V), 1) == tok_tm
              ).astype(jnp.float32)                                  # [SB,V]
    xg = (jnp.dot(onehot, slab_ref[_ROW_FUSED:_ROW_FUSED + V, :],
                  preferred_element_type=jnp.float32)
          + slab_ref[_ROW_BIAS:_ROW_BIAS + 1, :])                    # [SB,4H]

    w_hh = slab_ref[_ROW_WHH:_ROW_WHH + H, :]                        # [H,4H]

    # One tanh per step: sigmoid(x) = 0.5*tanh(0.5x)+0.5 on the i/f/o lane
    # blocks, tanh(x) on the g block, folded into per-lane scale/offset
    # vectors hoisted out of the unrolled loop.
    lane = lax.broadcasted_iota(jnp.int32, (B, G), 1)
    g_block = (lane >= 2 * H) & (lane < 3 * H)
    scale = jnp.where(g_block, 1.0, 0.5)                             # [B,4H]
    offset = jnp.where(g_block, 0.0, 0.5)                            # [B,4H]

    h = jnp.zeros((B, H), jnp.float32)        # _init_state: zero h0 / c0
    c = jnp.zeros((B, H), jnp.float32)
    outs = []
    # Fully unrolled recurrence (S is static and small): one MXU dot per step.
    for t in range(S):
        gates = xg[t * B:(t + 1) * B, :] + jnp.dot(
            h, w_hh, preferred_element_type=jnp.float32)             # [B,4H]
        act = scale * jnp.tanh(scale * gates) + offset
        # PyTorch LSTM gate order: input, forget, cell(g), output.
        i_g = act[:, 0 * H:1 * H]
        f_g = act[:, 1 * H:2 * H]
        g_g = act[:, 2 * H:3 * H]
        o_g = act[:, 3 * H:4 * H]
        c_new = f_g * c + i_g * g_g
        h_new = o_g * jnp.tanh(c_new)
        # pack_padded_sequence: state freezes past each sequence's length;
        # pad_packed_sequence: padded output positions are zero.
        valid = lengths > t                                          # [B,1]
        h = jnp.where(valid, h_new, h)
        c = jnp.where(valid, c_new, c)
        outs.append(jnp.where(valid, h_new, 0.0))

    # h_t = tanh(encoder2decoder(hidden[0][-1])). w_e2d / b_e2d occupy lanes
    # [:H] of their slab rows (rest zero), so lanes [H:] give tanh(0)=0.
    ht = jnp.tanh(jnp.dot(h, slab_ref[_ROW_WE2D:_ROW_WE2D + H, :],
                          preferred_element_type=jnp.float32)
                  + slab_ref[_ROW_BE2D:_ROW_BE2D + 1, :])[:, :H]

    # Single lane-dense (3*128-wide) unmasked store of every result.
    out_ref[...] = jnp.concatenate(
        outs + [h, c, ht, jnp.zeros((B, H), jnp.float32)], axis=1)


def language_encoder_forward(instruction, slab):
    """instruction: int [B, S] token ids; 0 = trailing padding."""
    B, S = instruction.shape
    H = HIDDEN

    vmem = pl.BlockSpec(memory_space=pltpu.MemorySpace.VMEM)
    out_slab = pl.pallas_call(
        _lang_encoder_kernel,
        out_shape=jax.ShapeDtypeStruct((B, (S + 4) * H), jnp.float32),
        in_specs=[vmem, vmem],
        out_specs=vmem,
    )(instruction.astype(jnp.int32), slab)

    h_f = out_slab[:, S * H:(S + 1) * H]              # hidden[0][-1]
    if FINAL_STATE_ONLY:
        return h_f                                    # hidden[0].squeeze(0)

    output = out_slab[:, :S * H].reshape(B, S, H)     # batch_first, contiguous
    c_f = out_slab[:, (S + 1) * H:(S + 2) * H]        # hidden[1][-1]
    h_t = out_slab[:, (S + 2) * H:(S + 3) * H]        # tanh(Linear(hidden[0][-1]))
    # TODO(synk): pad_packed_sequence truncates the time axis to max(lengths);
    # we keep the full S axis (identical when the longest sequence spans S).
    return output, (h_t[None, :, :], c_f[None, :, :])


def init_params(key):
    ks = jax.random.split(key, 7)
    s = 0.1
    emb = jax.random.normal(ks[0], (VOCAB, EMBED), jnp.float32) * s
    emb = emb.at[0].set(0.0)                                   # padding_idx=0
    w_ih = jax.random.normal(ks[1], (EMBED, 4 * HIDDEN), jnp.float32) * s
    w_hh = jax.random.normal(ks[2], (HIDDEN, 4 * HIDDEN), jnp.float32) * s
    b_ih = jax.random.normal(ks[3], (1, 4 * HIDDEN), jnp.float32) * s
    b_hh = jax.random.normal(ks[4], (1, 4 * HIDDEN), jnp.float32) * s
    w_e2d = jax.random.normal(ks[5], (HIDDEN, HIDDEN), jnp.float32) * s
    b_e2d = jax.random.normal(ks[6], (1, HIDDEN), jnp.float32) * s
    return dict(embedding=emb, w_ih=w_ih, w_hh=w_hh, b_ih=b_ih, b_hh=b_hh,
                w_e2d=w_e2d, b_e2d=b_e2d)


def pack_params(p):
    """Pack all parameters into one [_SLAB_ROWS, 4H] f32 slab (single DMA).

    Fuses the embedding with the input projection (emb @ W_ih; row 0 stays
    zero, matching padding_idx=0) so the kernel does one MXU pass per token.
    """
    fused = p["embedding"] @ p["w_ih"]                         # [V, 4H]
    slab = jnp.zeros((_SLAB_ROWS, _G), jnp.float32)
    slab = slab.at[_ROW_FUSED:_ROW_FUSED + VOCAB, :].set(fused)
    slab = slab.at[_ROW_WHH:_ROW_WHH + HIDDEN, :].set(p["w_hh"])
    slab = slab.at[_ROW_BIAS, :].set((p["b_ih"] + p["b_hh"])[0])
    slab = slab.at[_ROW_WE2D:_ROW_WE2D + HIDDEN, :HIDDEN].set(p["w_e2d"])
    slab = slab.at[_ROW_BE2D, :HIDDEN].set(p["b_e2d"][0])
    return slab


def _reference_forward(instruction, p):
    """Pure-JAX mirror of the PyTorch module (eval, dropout p=0, 1-layer LSTM)."""
    B, S = instruction.shape
    H = HIDDEN
    lengths = jnp.sum((instruction != 0).astype(jnp.int32), axis=1)
    x = p["embedding"][instruction]                            # [B,S,E]
    b = (p["b_ih"] + p["b_hh"])[0]
    h = jnp.zeros((B, H), jnp.float32)
    c = jnp.zeros((B, H), jnp.float32)
    outs = []
    for t in range(S):
        gates = x[:, t, :] @ p["w_ih"] + h @ p["w_hh"] + b
        i_g = jax.nn.sigmoid(gates[:, 0 * H:1 * H])
        f_g = jax.nn.sigmoid(gates[:, 1 * H:2 * H])
        g_g = jnp.tanh(gates[:, 2 * H:3 * H])
        o_g = jax.nn.sigmoid(gates[:, 3 * H:4 * H])
        c_new = f_g * c + i_g * g_g
        h_new = o_g * jnp.tanh(c_new)
        valid = (lengths > t)[:, None]
        h = jnp.where(valid, h_new, h)
        c = jnp.where(valid, c_new, c)
        outs.append(jnp.where(valid, h_new, 0.0))
    output = jnp.stack(outs, axis=1)
    h_t = jnp.tanh(h @ p["w_e2d"] + p["b_e2d"][0])
    return output, (h_t[None], c[None])


if __name__ == "__main__":
    key = jax.random.PRNGKey(0)
    pkey, ikey = jax.random.split(key)
    params = init_params(pkey)
    slab = pack_params(params)

    B, S = 2, 8
    instruction = jax.random.randint(ikey, (B, S), 1, VOCAB, dtype=jnp.int32)
    # Trailing padding on batch element 1; element 0 spans the full S so the
    # pad_packed time axis equals S.
    instruction = instruction.at[1, 5:].set(0)

    fwd = jax.jit(lambda x: language_encoder_forward(x, slab))
    output, (h_t, c_t) = fwd(instruction)
    jax.block_until_ready((output, h_t, c_t))

    assert output.shape == (B, S, HIDDEN)
    assert h_t.shape == (1, B, HIDDEN)
    assert c_t.shape == (1, B, HIDDEN)
    # Padded timesteps must be exactly zero (pad_packed_sequence behavior).
    assert float(jnp.max(jnp.abs(output[1, 5:, :]))) == 0.0

    # Numerical check against the pure-JAX mirror of the PyTorch forward
    # (loose tolerance: EUP-tanh-based sigmoid + MXU f32 matmul path).
    ref_out, (ref_ht, ref_ct) = _reference_forward(instruction, params)
    assert jnp.allclose(output, ref_out, atol=2e-3, rtol=2e-3)
    assert jnp.allclose(h_t, ref_ht, atol=2e-3, rtol=2e-3)
    assert jnp.allclose(c_t, ref_ct, atol=2e-3, rtol=2e-3)

    print("KERNEL_OK")
</pallas_src>

<mosaic_0001>
module attributes {stable_mosaic.version = 11 : i64} {
  func.func @_lang_encoder_kernel(%arg0: memref<2x8xi32, #tpu.memory_space<vmem>>, %arg1: memref<136x128xf32, #tpu.memory_space<vmem>>, %arg2: memref<2x384xf32, #tpu.memory_space<vmem>>) attributes {dimension_semantics = [], scalar_prefetch = 0 : i64, scratch_operands = 0 : i64, tpu.core_type = #tpu.core_type<tc>} {
    %c0 = arith.constant 0 : index
    %c0_0 = arith.constant 0 : index
    %0 = vector.load %arg0[%c0, %c0_0] : memref<2x8xi32, #tpu.memory_space<vmem>>, vector<2x8xi32>
    %c0_i32 = arith.constant 0 : i32
    %1 = vector.broadcast %c0_i32 : i32 to vector<2x8xi32>
    %2 = arith.cmpi ne, %0, %1 : vector<2x8xi32>
    %3 = arith.extui %2 : vector<2x8xi1> to vector<2x8xi32>
    %4 = arith.sitofp %3 : vector<2x8xi32> to vector<2x8xf32>
    %cst = arith.constant dense<0.000000e+00> : vector<2xf32>
    %5 = vector.multi_reduction <add>, %4, %cst [1] : vector<2x8xf32> to vector<2xf32>
    %6 = vector.shape_cast %5 : vector<2xf32> to vector<2x1xf32>
    %7 = vector.extract_strided_slice %0 {offsets = [0, 0], sizes = [2, 1], strides = [1, 1]} : vector<2x8xi32> to vector<2x1xi32>
    %8 = vector.extract_strided_slice %0 {offsets = [0, 1], sizes = [2, 1], strides = [1, 1]} : vector<2x8xi32> to vector<2x1xi32>
    %9 = vector.extract_strided_slice %0 {offsets = [0, 2], sizes = [2, 1], strides = [1, 1]} : vector<2x8xi32> to vector<2x1xi32>
    %10 = vector.extract_strided_slice %0 {offsets = [0, 3], sizes = [2, 1], strides = [1, 1]} : vector<2x8xi32> to vector<2x1xi32>
    %11 = vector.extract_strided_slice %0 {offsets = [0, 4], sizes = [2, 1], strides = [1, 1]} : vector<2x8xi32> to vector<2x1xi32>
    %12 = vector.extract_strided_slice %0 {offsets = [0, 5], sizes = [2, 1], strides = [1, 1]} : vector<2x8xi32> to vector<2x1xi32>
    %13 = vector.extract_strided_slice %0 {offsets = [0, 6], sizes = [2, 1], strides = [1, 1]} : vector<2x8xi32> to vector<2x1xi32>
    %14 = vector.extract_strided_slice %0 {offsets = [0, 7], sizes = [2, 1], strides = [1, 1]} : vector<2x8xi32> to vector<2x1xi32>
    %15 = tpu.concatenate %7, %8, %9, %10, %11, %12, %13, %14 in 0 : vector<2x1xi32>, vector<2x1xi32>, vector<2x1xi32>, vector<2x1xi32>, vector<2x1xi32>, vector<2x1xi32>, vector<2x1xi32>, vector<2x1xi32> -> vector<16x1xi32>
    %16 = tpu.iota {dimensions = array<i32: 1>} : vector<16x50xi32>
    %17 = vector.broadcast %15 : vector<16x1xi32> to vector<16x50xi32>
    %18 = arith.cmpi eq, %16, %17 : vector<16x50xi32>
    %19 = arith.extui %18 : vector<16x50xi1> to vector<16x50xi32>
    %20 = arith.sitofp %19 : vector<16x50xi32> to vector<16x50xf32>
    %c0_1 = arith.constant 0 : index
    %c0_2 = arith.constant 0 : index
    %21 = vector.load %arg1[%c0_1, %c0_2] : memref<136x128xf32, #tpu.memory_space<vmem>>, vector<50x128xf32>
    %cst_3 = arith.constant dense<0.000000e+00> : vector<16x128xf32>
    %22 = tpu.matmul %20, %21, %cst_3 {dimension_numbers = #tpu.dot_dimension_numbers<[1], [0], [0], [1], [0, 0, 1, 1], [], []>} : vector<16x50xf32>, vector<50x128xf32>, vector<16x128xf32> -> vector<16x128xf32>
    %c88 = arith.constant 88 : index
    %c0_4 = arith.constant 0 : index
    %23 = vector.load %arg1[%c88, %c0_4] : memref<136x128xf32, #tpu.memory_space<vmem>>, vector<1x128xf32>
    %24 = vector.broadcast %23 : vector<1x128xf32> to vector<16x128xf32>
    %25 = arith.addf %22, %24 : vector<16x128xf32>
    %c56 = arith.constant 56 : index
    %c0_5 = arith.constant 0 : index
    %26 = vector.load %arg1[%c56, %c0_5] : memref<136x128xf32, #tpu.memory_space<vmem>>, vector<32x128xf32>
    %27 = tpu.iota {dimensions = array<i32: 1>} : vector<2x128xi32>
    %c64_i32 = arith.constant 64 : i32
    %28 = vector.broadcast %c64_i32 : i32 to vector<2x128xi32>
    %29 = arith.cmpi sge, %27, %28 : vector<2x128xi32>
    %c96_i32 = arith.constant 96 : i32
    %30 = vector.broadcast %c96_i32 : i32 to vector<2x128xi32>
    %31 = arith.cmpi slt, %27, %30 : vector<2x128xi32>
    %32 = arith.andi %29, %31 : vector<2x128xi1>
    %cst_6 = arith.constant 1.000000e+00 : f32
    %cst_7 = arith.constant 5.000000e-01 : f32
    %33 = vector.broadcast %cst_6 : f32 to vector<2x128xf32>
    %34 = vector.broadcast %cst_7 : f32 to vector<2x128xf32>
    %35 = arith.select %32, %33, %34 : vector<2x128xi1>, vector<2x128xf32>
    %cst_8 = arith.constant 0.000000e+00 : f32
    %cst_9 = arith.constant 5.000000e-01 : f32
    %36 = vector.broadcast %cst_8 : f32 to vector<2x128xf32>
    %37 = vector.broadcast %cst_9 : f32 to vector<2x128xf32>
    %38 = arith.select %32, %36, %37 : vector<2x128xi1>, vector<2x128xf32>
    %cst_10 = arith.constant 0.000000e+00 : f32
    %39 = vector.broadcast %cst_10 : f32 to vector<2x32xf32>
    %cst_11 = arith.constant 0.000000e+00 : f32
    %40 = vector.broadcast %cst_11 : f32 to vector<2x32xf32>
    %41 = vector.extract_strided_slice %25 {offsets = [0, 0], sizes = [2, 128], strides = [1, 1]} : vector<16x128xf32> to vector<2x128xf32>
    %cst_12 = arith.constant dense<0.000000e+00> : vector<2x128xf32>
    %42 = tpu.matmul %39, %26, %cst_12 {dimension_numbers = #tpu.dot_dimension_numbers<[1], [0], [0], [1], [0, 0, 1, 1], [], []>} : vector<2x32xf32>, vector<32x128xf32>, vector<2x128xf32> -> vector<2x128xf32>
    %43 = arith.addf %41, %42 : vector<2x128xf32>
    %44 = arith.mulf %35, %43 : vector<2x128xf32>
    %45 = math.tanh %44 : vector<2x128xf32>
    %46 = arith.mulf %35, %45 : vector<2x128xf32>
    %47 = arith.addf %46, %38 : vector<2x128xf32>
    %48 = vector.extract_strided_slice %47 {offsets = [0, 0], sizes = [2, 32], strides = [1, 1]} : vector<2x128xf32> to vector<2x32xf32>
    %49 = vector.extract_strided_slice %47 {offsets = [0, 32], sizes = [2, 32], strides = [1, 1]} : vector<2x128xf32> to vector<2x32xf32>
    %50 = vector.extract_strided_slice %47 {offsets = [0, 64], sizes = [2, 32], strides = [1, 1]} : vector<2x128xf32> to vector<2x32xf32>
    %51 = vector.extract_strided_slice %47 {offsets = [0, 96], sizes = [2, 32], strides = [1, 1]} : vector<2x128xf32> to vector<2x32xf32>
    %52 = arith.mulf %49, %40 : vector<2x32xf32>
    %53 = arith.mulf %48, %50 : vector<2x32xf32>
    %54 = arith.addf %52, %53 : vector<2x32xf32>
    %55 = math.tanh %54 : vector<2x32xf32>
    %56 = arith.mulf %51, %55 : vector<2x32xf32>
    %cst_13 = arith.constant 0.000000e+00 : f32
    %57 = vector.broadcast %cst_13 : f32 to vector<2x1xf32>
    %58 = arith.cmpf ogt, %6, %57 : vector<2x1xf32>
    %59 = vector.shape_cast %58 : vector<2x1xi1> to vector<2x1xi1>
    %60 = vector.broadcast %59 : vector<2x1xi1> to vector<2x32xi1>
    %61 = arith.select %60, %56, %39 : vector<2x32xi1>, vector<2x32xf32>
    %62 = vector.shape_cast %58 : vector<2x1xi1> to vector<2x1xi1>
    %63 = vector.broadcast %62 : vector<2x1xi1> to vector<2x32xi1>
    %64 = arith.select %63, %54, %40 : vector<2x32xi1>, vector<2x32xf32>
    %cst_14 = arith.constant 0.000000e+00 : f32
    %65 = vector.shape_cast %58 : vector<2x1xi1> to vector<2x1xi1>
    %66 = vector.broadcast %65 : vector<2x1xi1> to vector<2x32xi1>
    %67 = vector.broadcast %cst_14 : f32 to vector<2x32xf32>
    %68 = arith.select %66, %56, %67 : vector<2x32xi1>, vector<2x32xf32>
    %69 = vector.extract_strided_slice %25 {offsets = [2, 0], sizes = [2, 128], strides = [1, 1]} : vector<16x128xf32> to vector<2x128xf32>
    %cst_15 = arith.constant dense<0.000000e+00> : vector<2x128xf32>
    %70 = tpu.matmul %61, %26, %cst_15 {dimension_numbers = #tpu.dot_dimension_numbers<[1], [0], [0], [1], [0, 0, 1, 1], [], []>} : vector<2x32xf32>, vector<32x128xf32>, vector<2x128xf32> -> vector<2x128xf32>
    %71 = arith.addf %69, %70 : vector<2x128xf32>
    %72 = arith.mulf %35, %71 : vector<2x128xf32>
    %73 = math.tanh %72 : vector<2x128xf32>
    %74 = arith.mulf %35, %73 : vector<2x128xf32>
    %75 = arith.addf %74, %38 : vector<2x128xf32>
    %76 = vector.extract_strided_slice %75 {offsets = [0, 0], sizes = [2, 32], strides = [1, 1]} : vector<2x128xf32> to vector<2x32xf32>
    %77 = vector.extract_strided_slice %75 {offsets = [0, 32], sizes = [2, 32], strides = [1, 1]} : vector<2x128xf32> to vector<2x32xf32>
    %78 = vector.extract_strided_slice %75 {offsets = [0, 64], sizes = [2, 32], strides = [1, 1]} : vector<2x128xf32> to vector<2x32xf32>
    %79 = vector.extract_strided_slice %75 {offsets = [0, 96], sizes = [2, 32], strides = [1, 1]} : vector<2x128xf32> to vector<2x32xf32>
    %80 = arith.mulf %77, %64 : vector<2x32xf32>
    %81 = arith.mulf %76, %78 : vector<2x32xf32>
    %82 = arith.addf %80, %81 : vector<2x32xf32>
    %83 = math.tanh %82 : vector<2x32xf32>
    %84 = arith.mulf %79, %83 : vector<2x32xf32>
    %cst_16 = arith.constant 1.000000e+00 : f32
    %85 = vector.broadcast %cst_16 : f32 to vector<2x1xf32>
    %86 = arith.cmpf ogt, %6, %85 : vector<2x1xf32>
    %87 = vector.shape_cast %86 : vector<2x1xi1> to vector<2x1xi1>
    %88 = vector.broadcast %87 : vector<2x1xi1> to vector<2x32xi1>
    %89 = arith.select %88, %84, %61 : vector<2x32xi1>, vector<2x32xf32>
    %90 = vector.shape_cast %86 : vector<2x1xi1> to vector<2x1xi1>
    %91 = vector.broadcast %90 : vector<2x1xi1> to vector<2x32xi1>
    %92 = arith.select %91, %82, %64 : vector<2x32xi1>, vector<2x32xf32>
    %cst_17 = arith.constant 0.000000e+00 : f32
    %93 = vector.shape_cast %86 : vector<2x1xi1> to vector<2x1xi1>
    %94 = vector.broadcast %93 : vector<2x1xi1> to vector<2x32xi1>
    %95 = vector.broadcast %cst_17 : f32 to vector<2x32xf32>
    %96 = arith.select %94, %84, %95 : vector<2x32xi1>, vector<2x32xf32>
    %97 = vector.extract_strided_slice %25 {offsets = [4, 0], sizes = [2, 128], strides = [1, 1]} : vector<16x128xf32> to vector<2x128xf32>
    %cst_18 = arith.constant dense<0.000000e+00> : vector<2x128xf32>
    %98 = tpu.matmul %89, %26, %cst_18 {dimension_numbers = #tpu.dot_dimension_numbers<[1], [0], [0], [1], [0, 0, 1, 1], [], []>} : vector<2x32xf32>, vector<32x128xf32>, vector<2x128xf32> -> vector<2x128xf32>
    %99 = arith.addf %97, %98 : vector<2x128xf32>
    %100 = arith.mulf %35, %99 : vector<2x128xf32>
    %101 = math.tanh %100 : vector<2x128xf32>
    %102 = arith.mulf %35, %101 : vector<2x128xf32>
    %103 = arith.addf %102, %38 : vector<2x128xf32>
    %104 = vector.extract_strided_slice %103 {offsets = [0, 0], sizes = [2, 32], strides = [1, 1]} : vector<2x128xf32> to vector<2x32xf32>
    %105 = vector.extract_strided_slice %103 {offsets = [0, 32], sizes = [2, 32], strides = [1, 1]} : vector<2x128xf32> to vector<2x32xf32>
    %106 = vector.extract_strided_slice %103 {offsets = [0, 64], sizes = [2, 32], strides = [1, 1]} : vector<2x128xf32> to vector<2x32xf32>
    %107 = vector.extract_strided_slice %103 {offsets = [0, 96], sizes = [2, 32], strides = [1, 1]} : vector<2x128xf32> to vector<2x32xf32>
    %108 = arith.mulf %105, %92 : vector<2x32xf32>
    %109 = arith.mulf %104, %106 : vector<2x32xf32>
    %110 = arith.addf %108, %109 : vector<2x32xf32>
    %111 = math.tanh %110 : vector<2x32xf32>
    %112 = arith.mulf %107, %111 : vector<2x32xf32>
    %cst_19 = arith.constant 2.000000e+00 : f32
    %113 = vector.broadcast %cst_19 : f32 to vector<2x1xf32>
    %114 = arith.cmpf ogt, %6, %113 : vector<2x1xf32>
    %115 = vector.shape_cast %114 : vector<2x1xi1> to vector<2x1xi1>
    %116 = vector.broadcast %115 : vector<2x1xi1> to vector<2x32xi1>
    %117 = arith.select %116, %112, %89 : vector<2x32xi1>, vector<2x32xf32>
    %118 = vector.shape_cast %114 : vector<2x1xi1> to vector<2x1xi1>
    %119 = vector.broadcast %118 : vector<2x1xi1> to vector<2x32xi1>
    %120 = arith.select %119, %110, %92 : vector<2x32xi1>, vector<2x32xf32>
    %cst_20 = arith.constant 0.000000e+00 : f32
    %121 = vector.shape_cast %114 : vector<2x1xi1> to vector<2x1xi1>
    %122 = vector.broadcast %121 : vector<2x1xi1> to vector<2x32xi1>
    %123 = vector.broadcast %cst_20 : f32 to vector<2x32xf32>
    %124 = arith.select %122, %112, %123 : vector<2x32xi1>, vector<2x32xf32>
    %125 = vector.extract_strided_slice %25 {offsets = [6, 0], sizes = [2, 128], strides = [1, 1]} : vector<16x128xf32> to vector<2x128xf32>
    %cst_21 = arith.constant dense<0.000000e+00> : vector<2x128xf32>
    %126 = tpu.matmul %117, %26, %cst_21 {dimension_numbers = #tpu.dot_dimension_numbers<[1], [0], [0], [1], [0, 0, 1, 1], [], []>} : vector<2x32xf32>, vector<32x128xf32>, vector<2x128xf32> -> vector<2x128xf32>
    %127 = arith.addf %125, %126 : vector<2x128xf32>
    %128 = arith.mulf %35, %127 : vector<2x128xf32>
    %129 = math.tanh %128 : vector<2x128xf32>
    %130 = arith.mulf %35, %129 : vector<2x128xf32>
    %131 = arith.addf %130, %38 : vector<2x128xf32>
    %132 = vector.extract_strided_slice %131 {offsets = [0, 0], sizes = [2, 32], strides = [1, 1]} : vector<2x128xf32> to vector<2x32xf32>
    %133 = vector.extract_strided_slice %131 {offsets = [0, 32], sizes = [2, 32], strides = [1, 1]} : vector<2x128xf32> to vector<2x32xf32>
    %134 = vector.extract_strided_slice %131 {offsets = [0, 64], sizes = [2, 32], strides = [1, 1]} : vector<2x128xf32> to vector<2x32xf32>
    %135 = vector.extract_strided_slice %131 {offsets = [0, 96], sizes = [2, 32], strides = [1, 1]} : vector<2x128xf32> to vector<2x32xf32>
    %136 = arith.mulf %133, %120 : vector<2x32xf32>
    %137 = arith.mulf %132, %134 : vector<2x32xf32>
    %138 = arith.addf %136, %137 : vector<2x32xf32>
    %139 = math.tanh %138 : vector<2x32xf32>
    %140 = arith.mulf %135, %139 : vector<2x32xf32>
    %cst_22 = arith.constant 3.000000e+00 : f32
    %141 = vector.broadcast %cst_22 : f32 to vector<2x1xf32>
    %142 = arith.cmpf ogt, %6, %141 : vector<2x1xf32>
    %143 = vector.shape_cast %142 : vector<2x1xi1> to vector<2x1xi1>
    %144 = vector.broadcast %143 : vector<2x1xi1> to vector<2x32xi1>
    %145 = arith.select %144, %140, %117 : vector<2x32xi1>, vector<2x32xf32>
    %146 = vector.shape_cast %142 : vector<2x1xi1> to vector<2x1xi1>
    %147 = vector.broadcast %146 : vector<2x1xi1> to vector<2x32xi1>
    %148 = arith.select %147, %138, %120 : vector<2x32xi1>, vector<2x32xf32>
    %cst_23 = arith.constant 0.000000e+00 : f32
    %149 = vector.shape_cast %142 : vector<2x1xi1> to vector<2x1xi1>
    %150 = vector.broadcast %149 : vector<2x1xi1> to vector<2x32xi1>
    %151 = vector.broadcast %cst_23 : f32 to vector<2x32xf32>
    %152 = arith.select %150, %140, %151 : vector<2x32xi1>, vector<2x32xf32>
    %153 = vector.extract_strided_slice %25 {offsets = [8, 0], sizes = [2, 128], strides = [1, 1]} : vector<16x128xf32> to vector<2x128xf32>
    %cst_24 = arith.constant dense<0.000000e+00> : vector<2x128xf32>
    %154 = tpu.matmul %145, %26, %cst_24 {dimension_numbers = #tpu.dot_dimension_numbers<[1], [0], [0], [1], [0, 0, 1, 1], [], []>} : vector<2x32xf32>, vector<32x128xf32>, vector<2x128xf32> -> vector<2x128xf32>
    %155 = arith.addf %153, %154 : vector<2x128xf32>
    %156 = arith.mulf %35, %155 : vector<2x128xf32>
    %157 = math.tanh %156 : vector<2x128xf32>
    %158 = arith.mulf %35, %157 : vector<2x128xf32>
    %159 = arith.addf %158, %38 : vector<2x128xf32>
    %160 = vector.extract_strided_slice %159 {offsets = [0, 0], sizes = [2, 32], strides = [1, 1]} : vector<2x128xf32> to vector<2x32xf32>
    %161 = vector.extract_strided_slice %159 {offsets = [0, 32], sizes = [2, 32], strides = [1, 1]} : vector<2x128xf32> to vector<2x32xf32>
    %162 = vector.extract_strided_slice %159 {offsets = [0, 64], sizes = [2, 32], strides = [1, 1]} : vector<2x128xf32> to vector<2x32xf32>
    %163 = vector.extract_strided_slice %159 {offsets = [0, 96], sizes = [2, 32], strides = [1, 1]} : vector<2x128xf32> to vector<2x32xf32>
    %164 = arith.mulf %161, %148 : vector<2x32xf32>
    %165 = arith.mulf %160, %162 : vector<2x32xf32>
    %166 = arith.addf %164, %165 : vector<2x32xf32>
    %167 = math.tanh %166 : vector<2x32xf32>
    %168 = arith.mulf %163, %167 : vector<2x32xf32>
    %cst_25 = arith.constant 4.000000e+00 : f32
    %169 = vector.broadcast %cst_25 : f32 to vector<2x1xf32>
    %170 = arith.cmpf ogt, %6, %169 : vector<2x1xf32>
    %171 = vector.shape_cast %170 : vector<2x1xi1> to vector<2x1xi1>
    %172 = vector.broadcast %171 : vector<2x1xi1> to vector<2x32xi1>
    %173 = arith.select %172, %168, %145 : vector<2x32xi1>, vector<2x32xf32>
    %174 = vector.shape_cast %170 : vector<2x1xi1> to vector<2x1xi1>
    %175 = vector.broadcast %174 : vector<2x1xi1> to vector<2x32xi1>
    %176 = arith.select %175, %166, %148 : vector<2x32xi1>, vector<2x32xf32>
    %cst_26 = arith.constant 0.000000e+00 : f32
    %177 = vector.shape_cast %170 : vector<2x1xi1> to vector<2x1xi1>
    %178 = vector.broadcast %177 : vector<2x1xi1> to vector<2x32xi1>
    %179 = vector.broadcast %cst_26 : f32 to vector<2x32xf32>
    %180 = arith.select %178, %168, %179 : vector<2x32xi1>, vector<2x32xf32>
    %181 = vector.extract_strided_slice %25 {offsets = [10, 0], sizes = [2, 128], strides = [1, 1]} : vector<16x128xf32> to vector<2x128xf32>
    %cst_27 = arith.constant dense<0.000000e+00> : vector<2x128xf32>
    %182 = tpu.matmul %173, %26, %cst_27 {dimension_numbers = #tpu.dot_dimension_numbers<[1], [0], [0], [1], [0, 0, 1, 1], [], []>} : vector<2x32xf32>, vector<32x128xf32>, vector<2x128xf32> -> vector<2x128xf32>
    %183 = arith.addf %181, %182 : vector<2x128xf32>
    %184 = arith.mulf %35, %183 : vector<2x128xf32>
    %185 = math.tanh %184 : vector<2x128xf32>
    %186 = arith.mulf %35, %185 : vector<2x128xf32>
    %187 = arith.addf %186, %38 : vector<2x128xf32>
    %188 = vector.extract_strided_slice %187 {offsets = [0, 0], sizes = [2, 32], strides = [1, 1]} : vector<2x128xf32> to vector<2x32xf32>
    %189 = vector.extract_strided_slice %187 {offsets = [0, 32], sizes = [2, 32], strides = [1, 1]} : vector<2x128xf32> to vector<2x32xf32>
    %190 = vector.extract_strided_slice %187 {offsets = [0, 64], sizes = [2, 32], strides = [1, 1]} : vector<2x128xf32> to vector<2x32xf32>
    %191 = vector.extract_strided_slice %187 {offsets = [0, 96], sizes = [2, 32], strides = [1, 1]} : vector<2x128xf32> to vector<2x32xf32>
    %192 = arith.mulf %189, %176 : vector<2x32xf32>
    %193 = arith.mulf %188, %190 : vector<2x32xf32>
    %194 = arith.addf %192, %193 : vector<2x32xf32>
    %195 = math.tanh %194 : vector<2x32xf32>
    %196 = arith.mulf %191, %195 : vector<2x32xf32>
    %cst_28 = arith.constant 5.000000e+00 : f32
    %197 = vector.broadcast %cst_28 : f32 to vector<2x1xf32>
    %198 = arith.cmpf ogt, %6, %197 : vector<2x1xf32>
    %199 = vector.shape_cast %198 : vector<2x1xi1> to vector<2x1xi1>
    %200 = vector.broadcast %199 : vector<2x1xi1> to vector<2x32xi1>
    %201 = arith.select %200, %196, %173 : vector<2x32xi1>, vector<2x32xf32>
    %202 = vector.shape_cast %198 : vector<2x1xi1> to vector<2x1xi1>
    %203 = vector.broadcast %202 : vector<2x1xi1> to vector<2x32xi1>
    %204 = arith.select %203, %194, %176 : vector<2x32xi1>, vector<2x32xf32>
    %cst_29 = arith.constant 0.000000e+00 : f32
    %205 = vector.shape_cast %198 : vector<2x1xi1> to vector<2x1xi1>
    %206 = vector.broadcast %205 : vector<2x1xi1> to vector<2x32xi1>
    %207 = vector.broadcast %cst_29 : f32 to vector<2x32xf32>
    %208 = arith.select %206, %196, %207 : vector<2x32xi1>, vector<2x32xf32>
    %209 = vector.extract_strided_slice %25 {offsets = [12, 0], sizes = [2, 128], strides = [1, 1]} : vector<16x128xf32> to vector<2x128xf32>
    %cst_30 = arith.constant dense<0.000000e+00> : vector<2x128xf32>
    %210 = tpu.matmul %201, %26, %cst_30 {dimension_numbers = #tpu.dot_dimension_numbers<[1], [0], [0], [1], [0, 0, 1, 1], [], []>} : vector<2x32xf32>, vector<32x128xf32>, vector<2x128xf32> -> vector<2x128xf32>
    %211 = arith.addf %209, %210 : vector<2x128xf32>
    %212 = arith.mulf %35, %211 : vector<2x128xf32>
    %213 = math.tanh %212 : vector<2x128xf32>
    %214 = arith.mulf %35, %213 : vector<2x128xf32>
    %215 = arith.addf %214, %38 : vector<2x128xf32>
    %216 = vector.extract_strided_slice %215 {offsets = [0, 0], sizes = [2, 32], strides = [1, 1]} : vector<2x128xf32> to vector<2x32xf32>
    %217 = vector.extract_strided_slice %215 {offsets = [0, 32], sizes = [2, 32], strides = [1, 1]} : vector<2x128xf32> to vector<2x32xf32>
    %218 = vector.extract_strided_slice %215 {offsets = [0, 64], sizes = [2, 32], strides = [1, 1]} : vector<2x128xf32> to vector<2x32xf32>
    %219 = vector.extract_strided_slice %215 {offsets = [0, 96], sizes = [2, 32], strides = [1, 1]} : vector<2x128xf32> to vector<2x32xf32>
    %220 = arith.mulf %217, %204 : vector<2x32xf32>
    %221 = arith.mulf %216, %218 : vector<2x32xf32>
    %222 = arith.addf %220, %221 : vector<2x32xf32>
    %223 = math.tanh %222 : vector<2x32xf32>
    %224 = arith.mulf %219, %223 : vector<2x32xf32>
    %cst_31 = arith.constant 6.000000e+00 : f32
    %225 = vector.broadcast %cst_31 : f32 to vector<2x1xf32>
    %226 = arith.cmpf ogt, %6, %225 : vector<2x1xf32>
    %227 = vector.shape_cast %226 : vector<2x1xi1> to vector<2x1xi1>
    %228 = vector.broadcast %227 : vector<2x1xi1> to vector<2x32xi1>
    %229 = arith.select %228, %224, %201 : vector<2x32xi1>, vector<2x32xf32>
    %230 = vector.shape_cast %226 : vector<2x1xi1> to vector<2x1xi1>
    %231 = vector.broadcast %230 : vector<2x1xi1> to vector<2x32xi1>
    %232 = arith.select %231, %222, %204 : vector<2x32xi1>, vector<2x32xf32>
    %cst_32 = arith.constant 0.000000e+00 : f32
    %233 = vector.shape_cast %226 : vector<2x1xi1> to vector<2x1xi1>
    %234 = vector.broadcast %233 : vector<2x1xi1> to vector<2x32xi1>
    %235 = vector.broadcast %cst_32 : f32 to vector<2x32xf32>
    %236 = arith.select %234, %224, %235 : vector<2x32xi1>, vector<2x32xf32>
    %237 = vector.extract_strided_slice %25 {offsets = [14, 0], sizes = [2, 128], strides = [1, 1]} : vector<16x128xf32> to vector<2x128xf32>
    %cst_33 = arith.constant dense<0.000000e+00> : vector<2x128xf32>
    %238 = tpu.matmul %229, %26, %cst_33 {dimension_numbers = #tpu.dot_dimension_numbers<[1], [0], [0], [1], [0, 0, 1, 1], [], []>} : vector<2x32xf32>, vector<32x128xf32>, vector<2x128xf32> -> vector<2x128xf32>
    %239 = arith.addf %237, %238 : vector<2x128xf32>
    %240 = arith.mulf %35, %239 : vector<2x128xf32>
    %241 = math.tanh %240 : vector<2x128xf32>
    %242 = arith.mulf %35, %241 : vector<2x128xf32>
    %243 = arith.addf %242, %38 : vector<2x128xf32>
    %244 = vector.extract_strided_slice %243 {offsets = [0, 0], sizes = [2, 32], strides = [1, 1]} : vector<2x128xf32> to vector<2x32xf32>
    %245 = vector.extract_strided_slice %243 {offsets = [0, 32], sizes = [2, 32], strides = [1, 1]} : vector<2x128xf32> to vector<2x32xf32>
    %246 = vector.extract_strided_slice %243 {offsets = [0, 64], sizes = [2, 32], strides = [1, 1]} : vector<2x128xf32> to vector<2x32xf32>
    %247 = vector.extract_strided_slice %243 {offsets = [0, 96], sizes = [2, 32], strides = [1, 1]} : vector<2x128xf32> to vector<2x32xf32>
    %248 = arith.mulf %245, %232 : vector<2x32xf32>
    %249 = arith.mulf %244, %246 : vector<2x32xf32>
    %250 = arith.addf %248, %249 : vector<2x32xf32>
    %251 = math.tanh %250 : vector<2x32xf32>
    %252 = arith.mulf %247, %251 : vector<2x32xf32>
    %cst_34 = arith.constant 7.000000e+00 : f32
    %253 = vector.broadcast %cst_34 : f32 to vector<2x1xf32>
    %254 = arith.cmpf ogt, %6, %253 : vector<2x1xf32>
    %255 = vector.shape_cast %254 : vector<2x1xi1> to vector<2x1xi1>
    %256 = vector.broadcast %255 : vector<2x1xi1> to vector<2x32xi1>
    %257 = arith.select %256, %252, %229 : vector<2x32xi1>, vector<2x32xf32>
    %258 = vector.shape_cast %254 : vector<2x1xi1> to vector<2x1xi1>
    %259 = vector.broadcast %258 : vector<2x1xi1> to vector<2x32xi1>
    %260 = arith.select %259, %250, %232 : vector<2x32xi1>, vector<2x32xf32>
    %cst_35 = arith.constant 0.000000e+00 : f32
    %261 = vector.shape_cast %254 : vector<2x1xi1> to vector<2x1xi1>
    %262 = vector.broadcast %261 : vector<2x1xi1> to vector<2x32xi1>
    %263 = vector.broadcast %cst_35 : f32 to vector<2x32xf32>
    %264 = arith.select %262, %252, %263 : vector<2x32xi1>, vector<2x32xf32>
    %c96 = arith.constant 96 : index
    %c0_36 = arith.constant 0 : index
    %265 = vector.load %arg1[%c96, %c0_36] : memref<136x128xf32, #tpu.memory_space<vmem>>, vector<32x128xf32>
    %cst_37 = arith.constant dense<0.000000e+00> : vector<2x128xf32>
    %266 = tpu.matmul %257, %265, %cst_37 {dimension_numbers = #tpu.dot_dimension_numbers<[1], [0], [0], [1], [0, 0, 1, 1], [], []>} : vector<2x32xf32>, vector<32x128xf32>, vector<2x128xf32> -> vector<2x128xf32>
    %c128 = arith.constant 128 : index
    %c0_38 = arith.constant 0 : index
    %267 = vector.load %arg1[%c128, %c0_38] : memref<136x128xf32, #tpu.memory_space<vmem>>, vector<1x128xf32>
    %268 = vector.broadcast %267 : vector<1x128xf32> to vector<2x128xf32>
    %269 = arith.addf %266, %268 : vector<2x128xf32>
    %270 = math.tanh %269 : vector<2x128xf32>
    %271 = vector.extract_strided_slice %270 {offsets = [0, 0], sizes = [2, 32], strides = [1, 1]} : vector<2x128xf32> to vector<2x32xf32>
    %cst_39 = arith.constant 0.000000e+00 : f32
    %272 = vector.broadcast %cst_39 : f32 to vector<2x32xf32>
    %273 = tpu.concatenate %68, %96, %124, %152, %180, %208, %236, %264, %257, %260, %271, %272 in 1 : vector<2x32xf32>, vector<2x32xf32>, vector<2x32xf32>, vector<2x32xf32>, vector<2x32xf32>, vector<2x32xf32>, vector<2x32xf32>, vector<2x32xf32>, vector<2x32xf32>, vector<2x32xf32>, vector<2x32xf32>, vector<2x32xf32> -> vector<2x384xf32>
    %c0_40 = arith.constant 0 : index
    %c0_41 = arith.constant 0 : index
    %274 = vector.load %arg2[%c0_40, %c0_41] : memref<2x384xf32, #tpu.memory_space<vmem>>, vector<2x384xf32>
    tpu.vector_store %arg2[%c0_40, %c0_41], %273 {strides = array<i32>} : memref<2x384xf32, #tpu.memory_space<vmem>>, vector<2x384xf32>,
    return
  }
}

</mosaic_0001>

<bundles_post_ra>
// kernel: _lambda_.1
= control target key start
LH: loop header
LB: loop body
LE: loop exit
PB: predicated region body
PF: predicated region fallthrough
CT: control target
= control target key end

     0   :  { %7 = vsyncpa [#allocation3], 0  ;;  %s1190_s0 = inlined_call_operand.hbm [shape: s32[2,8], index: 0, kind: input, shape index: {}]   ;;  %s1191_s1 = inlined_call_operand.hbm [shape: f32[136,128], index: 1, kind: input, shape index: {}]   ;;  %s1192_s2 = inlined_call_operand.vmem [shape: f32[2,384], index: 2, kind: output, shape index: {}]  }
   0x1   :  { %s14_s11 = sshll.u32 %s1190_s0, 4  ;;  %s15_s11 = int_to_ptr.hbm [resolvable:$true] %s14_s11 }
   0x2   :  { %8 = vsyncpa [#allocation5], 0  ;;  %s884_s12 = smov [#allocation2]   ;;  %s24_s16 = sshll.u32 %s1191_s1, 4  ;;  %s25_s16 = int_to_ptr.hbm [resolvable:$true] %s24_s16 }
   0x3   :  { %s16_s13 = sshll.u32 %s884_s12, 4  ;;  %s885_s17 = smov [#allocation4]   ;;  %s17_s13 = int_to_ptr.vmem [resolvable:$true] %s16_s13 }
   0x4   :  { %19 = dma.hbm_to_vmem [thread:$0]  %s15_s11, 32, %s17_s13, [#allocation3]  }
   0x5   :  { %s26_s18 = sshll.u32 %s885_s17, 4  ;;  %s886_s19 = smov 128   ;;  %s27_s18 = int_to_ptr.vmem [resolvable:$true] %s26_s18 }
   0x6   :  { %s887_s20 = smov 8  }
   0x7   :  { %32 = dma.hbm_to_vmem [thread:$0]  %s25_s16, 2176, %s27_s18, [#allocation5], %s886_s19, %s886_s19, %s887_s20  }
   0x8   :  { %880 = dma.done.wait [#allocation3], 32  }
   0x9   :  { %881 = vsyncadd [#allocation3], 4294967264 }
   0xa   :  { %882 = dma.done.wait [#allocation5], 2176  }
   0xb   :  { %883 = vsyncadd [#allocation5], 4294965120  ;;  %v922_v0 = vld [vmem:[#allocation2] sm:$0x3]  ;;  %s888_s0 = smov 127   ;;  %s889_s1 = smov 125   ;;  %v75_v23 = vlaneseq }
   0xc   :  { %v49_v1 = vrot.slane %v922_v0, 6  ;;  %v55_v2 = vrot.slane %v922_v0, 2  ;;  %v52_v3 = vrot.slane %v922_v0, 4  ;;  %s890_s21 = smov 126   ;;  %v891_v4 = vmov 0   ;;  %v94_v6 = vld [vmem:[#allocation4 + $0x28] sm:$0xff] }
   0xd   :  { %794 = vset.pattern.permute.xlu1 %v891_v4  ;;  %795 = vset.pattern.permute.xlu0 %v891_v4  ;;  %vm66_vm0 = vcmask 1041408   ;;  %v95_v5 = vld [vmem:[#allocation4 + $0x30] sm:$0x3]  ;;  %v93_v8 = vld [vmem:[#allocation4 + $0x20] sm:$0xff]  ;;  %v937_v9 = vld [vmem:[#allocation4 + $0x48] sm:$0xff]  ;;  %vm68_vm1 = vcmask 1043456  }
   0xe   :  { %50 = vrot.lane.b32.xlu0 %v49_v1, %s888_s0  ;;  %56 = vrot.lane.b32.xlu1 %v55_v2, %s889_s1  ;;  %v934_v7 = vld [vmem:[#allocation4 + $0x50] sm:$0xff]  ;;  %v92_v10 = vld [vmem:[#allocation4 + $0x18] sm:$0xff]  ;;  %v90_v12 = vld [vmem:[#allocation4 + $0x8] sm:$0xff]  ;;  %vm70_vm2 = vcmask 1045504   ;;  %v892_v22 = vmov 0.0   ;;  %v975_v24 = vand.u32 127, %v75_v23 }
   0xf   :  { %766 = vmatpush.msk.msra.mxu0 %vm66_vm0, %v95_v5  ;;  %156 = vmatpush.msra.mxu1 %v934_v7  ;;  %v91_v11 = vld [vmem:[#allocation4 + $0x10] sm:$0xff]  ;;  %v89_v19 = vld [vmem:[#allocation4] sm:$0xff]  ;;  %v951_v21 = vld [vmem:[#allocation4 + $0x38] sm:$0xff]  ;;  %vm98_vm3 = vcmask 408576   ;;  %vm42_vm5 = vcmp.ne.s32.totalorder %v922_v0, 0  ;;  %vm45_vm6 = vcmask 58368  }
  0x10   :  { %208 = vmatpush.msra.mxu2 %v934_v7  ;;  %279 = vmatpush.msra.mxu3 %v934_v7  ;;  %v948_v20 = vld [vmem:[#allocation4 + $0x40] sm:$0xff]  ;;  %v763_v27 = vsel %vm42_vm5, 1.0, %v892_v22  ;;  %vm135_vm7 = vcmp.ge.s32.totalorder %v975_v24, 64  ;;  %vm136_vm8 = vcmp.lt.s32.totalorder %v975_v24, 96  ;;  %v984_v29 = vld [vmem:[#allocation4 + $0x58] ss:$0 sm:$0xff] }
  0x11   :  { %118 = vmatpush.msra.mxu0 %v94_v6  ;;  %157 = vmatpush.msra.mxu1 %v937_v9  ;;  %v46_v28 = vsel %vm45_vm6, %v763_v27, 0.0  ;;  %vm137_vm9 = vmand %vm135_vm7, %vm136_vm8  ;;  %v893_v33 = vmov 0.5   ;;  %s894_s22 = smov 64   ;;  %s895_s23 = smov 32   ;;  %vm140_vm11 = vcmask 261120   ;;  %vm738_vm6 = vcmask 523264  }
  0x12   :  { %209 = vmatpush.msra.mxu2 %v937_v9  ;;  %280 = vmatpush.msra.mxu3 %v937_v9  ;;  %v989_v34 = vsel %vm137_vm9, 1.0, %v893_v33  ;;  %v993_v38 = vsel %vm137_vm9, 0.0, %v893_v33  ;;  %s896_s24 = smov 96   ;;  %s897_s25 = smov 124   ;;  %vm740_vm7 = vcmask 785408  }
  0x13   :  { %119 = vmatpush.msra.mxu0 %v93_v8  ;;  %158 = vmatpush.msra.mxu1 %v948_v20  ;;  %s898_s26 = smov 121   ;;  %s899_s27 = smov 123  }
  0x14   :  { %210 = vmatpush.msra.mxu2 %v948_v20  ;;  %281 = vmatpush.msra.mxu3 %v948_v20  ;;  %s900_s28 = smov 122  }
  0x15   :  { %120 = vmatpush.msra.mxu0 %v92_v10  ;;  %159 = vmatpush.msra.mxu1 %v951_v21 }
  0x16   :  { %53 = vrot.lane.b32.xlu0 %v52_v3, %s890_s21  ;;  %160 = vmatmul.f32.vlgmr.msra.gmra.mxu1 %v892_v22 }
  0x17   :  { %121 = vmatpush.msra.mxu0 %v91_v11  ;;  %211 = vmatpush.msra.mxu2 %v951_v21 }
  0x18   :  { %282 = vmatpush.msra.mxu3 %v951_v21  ;;  %348 = vmatpush.msrb.mxu1 %v934_v7 }
  0x19   :  { %122 = vmatpush.msra.mxu0 %v90_v12  ;;  %417 = vmatpush.msrb.mxu2 %v934_v7 }
  0x1a   :  { %477 = vmatpush.msrb.mxu3 %v934_v7  ;;  %349 = vmatpush.msrb.mxu1 %v937_v9 }
  0x1b   :  { %123 = vmatpush.msra.mxu0 %v89_v19  ;;  %418 = vmatpush.msrb.mxu2 %v937_v9 }
  0x1c   :  { %478 = vmatpush.msrb.mxu3 %v937_v9  ;;  %350 = vmatpush.msrb.mxu1 %v948_v20 }
  0x1d   :  { %419 = vmatpush.msrb.mxu2 %v948_v20 }
  0x1e   :  { %479 = vmatpush.msrb.mxu3 %v948_v20  ;;  %351 = vmatpush.msrb.mxu1 %v951_v21 }
  0x1f   :  { %420 = vmatpush.msrb.mxu2 %v951_v21 }
  0x20   :  { %480 = vmatpush.msrb.mxu3 %v951_v21  ;;  %548 = vmatpush.msra.mxu1 %v934_v7 }
  0x22   :  { %549 = vmatpush.msra.mxu1 %v937_v9 }
  0x24   :  { %550 = vmatpush.msra.mxu1 %v948_v20 }
  0x26   :  { %551 = vmatpush.msra.mxu1 %v951_v21 }
  0x40   :  { %47 = vadd.xlane.f32.xlu0 %v46_v28 }
  0x80   :  { %v51_v13 = vpop.permute.xlu0 %50  ;;  %v57_v14 = vpop.permute.xlu1 %56 }
  0x81   :  { %v67_v15 = vsel %vm66_vm0, %v922_v0, %v51_v13 }
  0x88   :  { %v54_v16 = vpop.permute.xlu0 %53 }
  0x89   :  { %v69_v17 = vsel %vm68_vm1, %v67_v15, %v54_v16 }
  0x8a   :  { %v71_v18 = vsel %vm70_vm2, %v69_v17, %v57_v14 }
  0x8b   :  { %78 = vperm.xlu1 %794, %v71_v18  }
  0x93   :  { %v161_v31 = vpop.f32.mrf.mxu1 }
  0xb3   :  { %v1000_v47 = vpop.xlane.xlu0 %47 }
  0xb4   :  { %vm186_vm10 = vcmp.gt.f32.partialorder %v1000_v47, 0.0  ;;  %vm244_vm12 = vcmp.gt.f32.partialorder %v1000_v47, 1.0  ;;  %vm317_vm13 = vcmp.gt.f32.partialorder %v1000_v47, 2.0  ;;  %vm386_vm14 = vcmp.gt.f32.partialorder %v1000_v47, 3.0 }
  0xb5   :  { %vm655_vm5 = vcmp.gt.f32.partialorder %v1000_v47, 7.0 }
  0xfd   :  { %v79_v25 = vpop.permute.xlu1 %78 }
  0xfe   :  { %vm83_vm4 = vcmp.eq.s32.totalorder %v975_v24, %v79_v25 }
  0xff   :  { %v764_v26 = vsel %vm83_vm4, 1.0, %v892_v22  ;;  %vm586_vm4 = vcmp.gt.f32.partialorder %v1000_v47, 6.0 }
 0x100   :  { %767 = vmatmul.msk.f32.vlgmr.msra.gmra.mxu0 %vm98_vm3, %v764_v26 }
 0x17d   :  { %v125_v30 = vpop.f32.mrf.mxu0 }
 0x17e   :  { %v987_v32 = vadd.f32 %v984_v29, %v125_v30 }
 0x180   :  { %v164_v35 = vadd.f32 %v161_v31, %v987_v32 }
 0x182   :  { %v165_v36 = vmul.f32 %v164_v35, %v989_v34 }
 0x184   :  { %798 = vtanh.f32 %v165_v36 }
 0x18a   :  { %v799_v37 = vpop.eup %798 }
 0x18b   :  { %v167_v39 = vmul.f32 %v799_v37, %v989_v34 }
 0x18d   :  { %v168_v40 = vadd.f32 %v167_v39, %v993_v38 }
 0x18f   :  { %171 = vrot.lane.b32.xlu2 %v168_v40, %s894_s22  ;;  %v169_v43 = vmul.f32 0.0, %v168_v40 }
 0x1e9   :  { %v172_v41 = vpop.permute.xlu2 %171 }
 0x1ea   :  { %v174_v42 = vmul.f32 %v172_v41, %v168_v40 }
 0x1ec   :  { %176 = vrot.lane.b32.xlu2 %v174_v42, %s895_s23 }
 0x246   :  { %v177_v44 = vpop.permute.xlu2 %176 }
 0x247   :  { %v179_v45 = vadd.f32 %v177_v44, %v169_v43 }
 0x249   :  { %800 = vtanh.f32 %v179_v45  ;;  %v190_v61 = vsel %vm186_vm10, %v179_v45, 0.0 }
 0x24a   :  { %v225_v62 = vrot.slane %v190_v61, 6 }
 0x24f   :  { %v801_v46 = vpop.eup %800 }
 0x250   :  { %182 = vrot.lane.b32.xlu1 %v801_v46, %s894_s22 }
 0x2c2   :  { %v183_v48 = vpop.permute.xlu1 %182 }
 0x2c3   :  { %v185_v49 = vmul.f32 %v183_v48, %v168_v40 }
 0x2c5   :  { %v189_v50 = vsel %vm186_vm10, %v185_v49, 0.0 }
 0x2c6   :  { %192 = vrot.lane.b32.xlu2 %v189_v50, %s895_s23 }
 0x320   :  { %v1006_v51 = vpop.permute.xlu2 %192 }
 0x321   :  { %769 = vmatmul.msk.f32.vlgmr.msra.gmra.mxu2 %vm140_vm11, %v1006_v51 }
 0x322   :  { %617 = vmatpush.msra.mxu2 %v934_v7 }
 0x324   :  { %618 = vmatpush.msra.mxu2 %v937_v9 }
 0x326   :  { %619 = vmatpush.msra.mxu2 %v948_v20 }
 0x328   :  { %620 = vmatpush.msra.mxu2 %v951_v21 }
 0x3a4   :  { %v213_v52 = vpop.f32.mrf.mxu2 }
 0x3a5   :  { %v217_v53 = vrot.slane %v213_v52, 6 }
 0x3a7   :  { %v219_v54 = vadd.f32 %v217_v53, %v987_v32 }
 0x3a9   :  { %v220_v55 = vmul.f32 %v219_v54, %v989_v34 }
 0x3ab   :  { %802 = vtanh.f32 %v220_v55 }
 0x3b1   :  { %v803_v56 = vpop.eup %802 }
 0x3b2   :  { %v222_v57 = vmul.f32 %v803_v56, %v989_v34 }
 0x3b4   :  { %v223_v58 = vadd.f32 %v222_v57, %v993_v38 }
 0x3b6   :  { %229 = vrot.lane.b32.xlu1 %v223_v58, %s894_s22  ;;  %v227_v63 = vmul.f32 %v225_v62, %v223_v58 }
 0x428   :  { %v230_v59 = vpop.permute.xlu1 %229 }
 0x429   :  { %v232_v60 = vmul.f32 %v230_v59, %v223_v58 }
 0x42b   :  { %234 = vrot.lane.b32.xlu2 %v232_v60, %s895_s23 }
 0x485   :  { %v235_v4 = vpop.permute.xlu2 %234 }
 0x486   :  { %v237_v5 = vadd.f32 %v235_v4, %v227_v63 }
 0x488   :  { %804 = vtanh.f32 %v237_v5  ;;  %v255_v7 = vrot.slane %v237_v5, 2 }
 0x48e   :  { %v805_v6 = vpop.eup %804 }
 0x48f   :  { %240 = vrot.lane.b32.xlu1 %v805_v6, %s894_s22 }
 0x497   :  { %256 = vrot.lane.b32.xlu1 %v255_v7, %s896_s24 }
 0x501   :  { %v241_v8 = vpop.permute.xlu1 %240 }
 0x502   :  { %v243_v9 = vmul.f32 %v241_v8, %v223_v58 }
 0x504   :  { %v248_v10 = vrot.slane %v243_v9, 2 }
 0x506   :  { %249 = vrot.lane.b32.xlu2 %v248_v10, %s895_s23 }
 0x509   :  { %v257_v14 = vpop.permute.xlu1 %256 }
 0x50e   :  { %259 = vrot.lane.b32.xlu2 %v190_v61, %s896_s24 }
 0x560   :  { %v250_v11 = vpop.permute.xlu2 %249 }
 0x561   :  { %v253_v12 = vsel %vm244_vm12, %v250_v11, %v1006_v51  ;;  %v1028_v13 = vsel %vm244_vm12, %v250_v11, 0.0 }
 0x562   :  { %770 = vmatmul.msk.f32.vlgmr.msra.gmra.mxu3 %vm140_vm11, %v253_v12 }
 0x568   :  { %v260_v15 = vpop.permute.xlu2 %259 }
 0x569   :  { %v262_v16 = vsel %vm244_vm12, %v257_v14, %v260_v15 }
 0x56a   :  { %v296_v17 = vrot.slane %v262_v16, 4 }
 0x56c   :  { %297 = vrot.lane.b32.xlu2 %v296_v17, %s895_s23 }
 0x5c6   :  { %v298_v30 = vpop.permute.xlu2 %297 }
 0x5e5   :  { %v284_v18 = vpop.f32.mrf.mxu3 }
 0x5e6   :  { %v288_v19 = vrot.slane %v284_v18, 4 }
 0x5e8   :  { %v290_v20 = vadd.f32 %v288_v19, %v987_v32 }
 0x5ea   :  { %v291_v21 = vmul.f32 %v290_v20, %v989_v34 }
 0x5ec   :  { %806 = vtanh.f32 %v291_v21 }
 0x5f2   :  { %v807_v23 = vpop.eup %806 }
 0x5f3   :  { %v293_v25 = vmul.f32 %v807_v23, %v989_v34 }
 0x5f5   :  { %v294_v26 = vadd.f32 %v293_v25, %v993_v38 }
 0x5f7   :  { %302 = vrot.lane.b32.xlu1 %v294_v26, %s894_s22  ;;  %v300_v31 = vmul.f32 %v298_v30, %v294_v26 }
 0x669   :  { %v303_v27 = vpop.permute.xlu1 %302 }
 0x66a   :  { %v305_v28 = vmul.f32 %v303_v27, %v294_v26 }
 0x66c   :  { %307 = vrot.lane.b32.xlu1 %v305_v28, %s895_s23 }
 0x6de   :  { %v308_v33 = vpop.permute.xlu1 %307 }
 0x6df   :  { %v310_v35 = vadd.f32 %v308_v33, %v300_v31 }
 0x6e1   :  { %808 = vtanh.f32 %v310_v35  ;;  %v327_v36 = vrot.slane %v310_v35, 4 }
 0x6e3   :  { %328 = vrot.lane.b32.xlu1 %v327_v36, %s896_s24 }
 0x6e7   :  { %v809_v37 = vpop.eup %808 }
 0x6e8   :  { %313 = vrot.lane.b32.xlu2 %v809_v37, %s894_s22 }
 0x742   :  { %v314_v39 = vpop.permute.xlu2 %313 }
 0x743   :  { %v316_v40 = vmul.f32 %v314_v39, %v294_v26 }
 0x745   :  { %v321_v41 = vrot.slane %v316_v40, 4 }
 0x747   :  { %322 = vrot.lane.b32.xlu0 %v321_v41, %s895_s23 }
 0x755   :  { %v329_v42 = vpop.permute.xlu1 %328 }
 0x756   :  { %v331_v43 = vsel %vm317_vm13, %v329_v42, %v262_v16 }
 0x757   :  { %v365_v44 = vrot.slane %v331_v43, 2 }
 0x759   :  { %366 = vrot.lane.b32.xlu1 %v365_v44, %s895_s23 }
 0x761   :  { %58 = vrot.lane.b32.xlu1 %v922_v0, %s897_s25 }
 0x769   :  { %64 = vrot.lane.b32.xlu1 %v55_v2, %s898_s26 }
 0x7b9   :  { %v1045_v45 = vpop.permute.xlu0 %322 }
 0x7ba   :  { %v325_v46 = vsel %vm317_vm13, %v1045_v45, %v253_v12 }
 0x7bb   :  { %771 = vmatmul.msk.f32.vlgmr.msrb.gmra.mxu1 %vm140_vm11, %v325_v46 }
 0x7cb   :  { %v367_v2 = vpop.permute.xlu1 %366 }
 0x7d3   :  { %v59_v62 = vpop.permute.xlu1 %58 }
 0x7db   :  { %v65_v63 = vpop.permute.xlu1 %64 }
 0x838   :  { %v353_v48 = vpop.f32.mrf.mxu1 }
 0x839   :  { %v357_v49 = vrot.slane %v353_v48, 2 }
 0x83b   :  { %v359_v50 = vadd.f32 %v357_v49, %v987_v32 }
 0x83d   :  { %v360_v52 = vmul.f32 %v359_v50, %v989_v34 }
 0x83f   :  { %810 = vtanh.f32 %v360_v52 }
 0x845   :  { %v811_v53 = vpop.eup %810 }
 0x846   :  { %v362_v54 = vmul.f32 %v811_v53, %v989_v34 }
 0x848   :  { %v363_v55 = vadd.f32 %v362_v54, %v993_v38 }
 0x84a   :  { %371 = vrot.lane.b32.xlu2 %v363_v55, %s894_s22  ;;  %v369_v32 = vmul.f32 %v367_v2, %v363_v55 }
 0x8a4   :  { %v372_v56 = vpop.permute.xlu2 %371 }
 0x8a5   :  { %v374_v57 = vmul.f32 %v372_v56, %v363_v55 }
 0x8a7   :  { %376 = vrot.lane.b32.xlu2 %v374_v57, %s895_s23 }
 0x8af   :  { %60 = vrot.lane.b32.xlu2 %v49_v1, %s899_s27 }
 0x901   :  { %v377_v58 = vpop.permute.xlu2 %376 }
 0x902   :  { %v379_v59 = vadd.f32 %v377_v58, %v369_v32 }
 0x904   :  { %812 = vtanh.f32 %v379_v59  ;;  %v396_v60 = vrot.slane %v379_v59, 6 }
 0x906   :  { %397 = vrot.lane.b32.xlu1 %v396_v60, %s896_s24 }
 0x909   :  { %v61_v8 = vpop.permute.xlu2 %60 }
 0x90a   :  { %v813_v61 = vpop.eup %812  ;;  %v72_v9 = vsel %vm66_vm0, %v59_v62, %v61_v8 }
 0x90b   :  { %382 = vrot.lane.b32.xlu0 %v813_v61, %s894_s22 }
 0x913   :  { %62 = vrot.lane.b32.xlu0 %v52_v3, %s900_s28 }
 0x978   :  { %v398_v4 = vpop.permute.xlu1 %397 }
 0x979   :  { %v400_v1 = vsel %vm386_vm14, %v398_v4, %v331_v43 }
 0x97a   :  { %431 = vrot.lane.b32.xlu1 %v400_v1, %s895_s23 }
 0x97d   :  { %v383_v5 = vpop.permute.xlu0 %382 }
 0x97e   :  { %v385_v6 = vmul.f32 %v383_v5, %v363_v55 }
 0x980   :  { %v390_v7 = vrot.slane %v385_v6, 6 }
 0x982   :  { %391 = vrot.lane.b32.xlu2 %v390_v7, %s895_s23 }
 0x985   :  { %v63_v0 = vpop.permute.xlu0 %62 }
 0x986   :  { %v73_v3 = vsel %vm68_vm1, %v72_v9, %v63_v0 }
 0x987   :  { %v74_v10 = vsel %vm70_vm2, %v73_v3, %v65_v63  ;;  %vm451_vm2 = vcmp.gt.f32.partialorder %v1000_v47, 4.0 }
 0x988   :  { %81 = vperm.xlu0 %795, %v74_v10  }
 0x9dc   :  { %v1074_v11 = vpop.permute.xlu2 %391 }
 0x9dd   :  { %v394_v12 = vsel %vm386_vm14, %v1074_v11, %v325_v46 }
 0x9de   :  { %454 = vrot.lane.b32.xlu1 %v394_v12, %s896_s24  ;;  %772 = vmatmul.msk.f32.vlgmr.msrb.gmra.mxu2 %vm140_vm11, %v394_v12 }
 0x9ec   :  { %v432_v26 = vpop.permute.xlu1 %431 }
 0x9fa   :  { %v82_v14 = vpop.permute.xlu0 %81 }
 0x9fb   :  { %vm84_vm15 = vcmp.eq.s32.totalorder %v975_v24, %v82_v14 }
 0x9fc   :  { %v765_v15 = vsel %vm84_vm15, 1.0, %v892_v22 }
 0x9fd   :  { %768 = vmatmul.msk.f32.gmra.mxu0 %vm98_vm3, %v765_v15  ;;  %vm513_vm3 = vcmp.gt.f32.partialorder %v1000_v47, 5.0 }
 0xa50   :  { %v455_v35 = vpop.permute.xlu1 %454 }
 0xa61   :  { %v422_v18 = vpop.f32.mrf.mxu2 }
 0xa7a   :  { %v128_v16 = vpop.f32.mrf.mxu0 }
 0xa7b   :  { %v1085_v17 = vadd.f32 %v984_v29, %v128_v16 }
 0xa7d   :  { %v425_v19 = vadd.f32 %v422_v18, %v1085_v17 }
 0xa7f   :  { %v426_v20 = vmul.f32 %v425_v19, %v989_v34 }
 0xa81   :  { %814 = vtanh.f32 %v426_v20 }
 0xa87   :  { %v815_v21 = vpop.eup %814 }
 0xa88   :  { %v428_v23 = vmul.f32 %v815_v21, %v989_v34 }
 0xa8a   :  { %v429_v25 = vadd.f32 %v428_v23, %v993_v38 }
 0xa8c   :  { %436 = vrot.lane.b32.xlu2 %v429_v25, %s894_s22  ;;  %v434_v29 = vmul.f32 %v432_v26, %v429_v25 }
 0xae6   :  { %v437_v22 = vpop.permute.xlu2 %436 }
 0xae7   :  { %v439_v24 = vmul.f32 %v437_v22, %v429_v25 }
 0xae9   :  { %441 = vrot.lane.b32.xlu2 %v439_v24, %s895_s23 }
 0xb43   :  { %v442_v27 = vpop.permute.xlu2 %441 }
 0xb44   :  { %v444_v28 = vadd.f32 %v442_v27, %v434_v29 }
 0xb46   :  { %816 = vtanh.f32 %v444_v28  ;;  %v458_v50 = vsel %vm451_vm2, %v444_v28, %v432_v26 }
 0xb47   :  { %v494_v52 = vrot.slane %v458_v50, 6 }
 0xb4c   :  { %v817_v30 = vpop.eup %816 }
 0xb4d   :  { %447 = vrot.lane.b32.xlu0 %v817_v30, %s894_s22 }
 0xbbf   :  { %v448_v31 = vpop.permute.xlu0 %447 }
 0xbc0   :  { %v1094_v33 = vmul.f32 %v448_v31, %v429_v25 }
 0xbc2   :  { %v457_v36 = vsel %vm451_vm2, %v1094_v33, %v455_v35 }
 0xbc3   :  { %461 = vrot.lane.b32.xlu2 %v457_v36, %s895_s23 }
 0xc1d   :  { %v462_v37 = vpop.permute.xlu2 %461 }
 0xc1e   :  { %773 = vmatmul.msk.f32.vlgmr.msrb.gmra.mxu3 %vm140_vm11, %v462_v37 }
 0xca1   :  { %v482_v39 = vpop.f32.mrf.mxu3 }
 0xca2   :  { %v486_v40 = vrot.slane %v482_v39, 6 }
 0xca4   :  { %v488_v41 = vadd.f32 %v486_v40, %v1085_v17 }
 0xca6   :  { %v489_v42 = vmul.f32 %v488_v41, %v989_v34 }
 0xca8   :  { %818 = vtanh.f32 %v489_v42 }
 0xcae   :  { %v819_v43 = vpop.eup %818 }
 0xcaf   :  { %v491_v44 = vmul.f32 %v819_v43, %v989_v34 }
 0xcb1   :  { %v492_v46 = vadd.f32 %v491_v44, %v993_v38 }
 0xcb3   :  { %498 = vrot.lane.b32.xlu0 %v492_v46, %s894_s22  ;;  %v496_v53 = vmul.f32 %v494_v52, %v492_v46 }
 0xd25   :  { %v499_v48 = vpop.permute.xlu0 %498 }
 0xd26   :  { %v501_v49 = vmul.f32 %v499_v48, %v492_v46 }
 0xd28   :  { %503 = vrot.lane.b32.xlu1 %v501_v49, %s895_s23 }
 0xd9a   :  { %v504_v54 = vpop.permute.xlu1 %503 }
 0xd9b   :  { %v506_v55 = vadd.f32 %v504_v54, %v496_v53 }
 0xd9d   :  { %820 = vtanh.f32 %v506_v55  ;;  %v524_v56 = vrot.slane %v506_v55, 2  ;;  %v674_v55 = vld [vmem:[#allocation4 + $0x78] sm:$0xff] }
 0xd9e   :  { %692 = vmatpush.msra.mxu3 %v674_v55 }
 0xd9f   :  { %525 = vrot.lane.b32.xlu1 %v524_v56, %s896_s24  ;;  %v673_v56 = vld [vmem:[#allocation4 + $0x70] sm:$0xff] }
 0xda0   :  { %693 = vmatpush.msra.mxu3 %v673_v56 }
 0xda3   :  { %v821_v57 = vpop.eup %820 }
 0xda4   :  { %509 = vrot.lane.b32.xlu2 %v821_v57, %s894_s22  ;;  %v672_v57 = vld [vmem:[#allocation4 + $0x68] sm:$0xff] }
 0xda5   :  { %694 = vmatpush.msra.mxu3 %v672_v57 }
 0xdac   :  { %528 = vrot.lane.b32.xlu2 %v458_v50, %s896_s24 }
 0xdfe   :  { %v510_v2 = vpop.permute.xlu2 %509 }
 0xdff   :  { %v512_v32 = vmul.f32 %v510_v2, %v492_v46  ;;  %v671_v2 = vld [vmem:[#allocation4 + $0x60] sm:$0xff] }
 0xe00   :  { %695 = vmatpush.msra.mxu3 %v671_v2 }
 0xe01   :  { %v517_v58 = vrot.slane %v512_v32, 2 }
 0xe03   :  { %518 = vrot.lane.b32.xlu0 %v517_v58, %s895_s23 }
 0xe06   :  { %v529_v59 = vpop.permute.xlu2 %528 }
 0xe11   :  { %v526_v60 = vpop.permute.xlu1 %525 }
 0xe12   :  { %v531_v61 = vsel %vm513_vm3, %v526_v60, %v529_v59  ;;  %v797_v59 = vld [vmem:[#allocation4 + $0x80] ss:$0 sm:$0xff] }
 0xe13   :  { %v565_v62 = vrot.slane %v531_v61, 4 }
 0xe15   :  { %566 = vrot.lane.b32.xlu1 %v565_v62, %s895_s23 }
 0xe75   :  { %v1118_v63 = vpop.permute.xlu0 %518 }
 0xe76   :  { %v522_v4 = vsel %vm513_vm3, %v1118_v63, %v462_v37  ;;  %v532_v54 = vsel %vm513_vm3, %v1118_v63, 0.0 }
 0xe77   :  { %774 = vmatmul.msk.f32.vlgmr.msra.gmra.mxu1 %vm140_vm11, %v522_v4 }
 0xe87   :  { %v567_v12 = vpop.permute.xlu1 %566 }
 0xef4   :  { %v553_v1 = vpop.f32.mrf.mxu1 }
 0xef5   :  { %v557_v5 = vrot.slane %v553_v1, 4 }
 0xef7   :  { %v559_v6 = vadd.f32 %v557_v5, %v1085_v17 }
 0xef9   :  { %v560_v7 = vmul.f32 %v559_v6, %v989_v34 }
 0xefb   :  { %822 = vtanh.f32 %v560_v7 }
 0xf01   :  { %v823_v8 = vpop.eup %822 }
 0xf02   :  { %v562_v9 = vmul.f32 %v823_v8, %v989_v34 }
 0xf04   :  { %v563_v0 = vadd.f32 %v562_v9, %v993_v38 }
 0xf06   :  { %571 = vrot.lane.b32.xlu0 %v563_v0, %s894_s22  ;;  %v569_v14 = vmul.f32 %v567_v12, %v563_v0 }
 0xf78   :  { %v572_v3 = vpop.permute.xlu0 %571 }
 0xf79   :  { %v574_v10 = vmul.f32 %v572_v3, %v563_v0 }
 0xf7b   :  { %576 = vrot.lane.b32.xlu2 %v574_v10, %s895_s23 }
 0xfd5   :  { %v577_v15 = vpop.permute.xlu2 %576 }
 0xfd6   :  { %v579_v16 = vadd.f32 %v577_v15, %v569_v14 }
 0xfd8   :  { %824 = vtanh.f32 %v579_v16  ;;  %v596_v18 = vrot.slane %v579_v16, 4 }
 0xfda   :  { %597 = vrot.lane.b32.xlu2 %v596_v18, %s896_s24 }
 0xfde   :  { %v825_v19 = vpop.eup %824 }
 0xfdf   :  { %582 = vrot.lane.b32.xlu0 %v825_v19, %s894_s22 }
0x1034   :  { %v598_v25 = vpop.permute.xlu2 %597 }
0x1035   :  { %v600_v22 = vsel %vm586_vm4, %v598_v25, %v531_v61 }
0x1036   :  { %v634_v24 = vrot.slane %v600_v22, 2 }
0x1051   :  { %v583_v20 = vpop.permute.xlu0 %582 }
0x1052   :  { %v585_v21 = vmul.f32 %v583_v20, %v563_v0 }
0x1054   :  { %v590_v23 = vrot.slane %v585_v21, 4 }
0x1056   :  { %591 = vrot.lane.b32.xlu1 %v590_v23, %s895_s23 }
0x105e   :  { %635 = vrot.lane.b32.xlu1 %v634_v24, %s895_s23 }
0x10c8   :  { %v592_v26 = vpop.permute.xlu1 %591 }
0x10c9   :  { %v594_v29 = vsel %vm586_vm4, %v592_v26, %v522_v4 }
0x10ca   :  { %775 = vmatmul.msk.f32.vlgmr.msra.gmra.mxu2 %vm140_vm11, %v594_v29 }
0x10d0   :  { %v636_v41 = vpop.permute.xlu1 %635 }
0x114d   :  { %v622_v27 = vpop.f32.mrf.mxu2 }
0x114e   :  { %v626_v28 = vrot.slane %v622_v27, 2 }
0x1150   :  { %v628_v30 = vadd.f32 %v626_v28, %v1085_v17 }
0x1152   :  { %v629_v31 = vmul.f32 %v628_v30, %v989_v34 }
0x1154   :  { %826 = vtanh.f32 %v629_v31 }
0x115a   :  { %v827_v35 = vpop.eup %826 }
0x115b   :  { %v631_v36 = vmul.f32 %v827_v35, %v989_v34  ;;  %v601_v34 = vsel %vm586_vm4, %v592_v26, 0.0 }
0x115d   :  { %v632_v37 = vadd.f32 %v631_v36, %v993_v38  ;;  %v459_v38 = vsel %vm451_vm2, %v1094_v33, 0.0  ;;  %v332_v33 = vsel %vm317_vm13, %v1045_v45, 0.0  ;;  %v401_v45 = vsel %vm386_vm14, %v1074_v11, 0.0 }
0x115f   :  { %640 = vrot.lane.b32.xlu0 %v632_v37, %s894_s22  ;;  %v638_v42 = vmul.f32 %v636_v41, %v632_v37 }
0x11d1   :  { %v641_v39 = vpop.permute.xlu0 %640 }
0x11d2   :  { %v643_v40 = vmul.f32 %v641_v39, %v632_v37 }
0x11d4   :  { %645 = vrot.lane.b32.xlu2 %v643_v40, %s895_s23 }
0x122e   :  { %v646_v43 = vpop.permute.xlu2 %645 }
0x122f   :  { %v648_v44 = vadd.f32 %v646_v43, %v638_v42 }
0x1231   :  { %828 = vtanh.f32 %v648_v44  ;;  %v665_v17 = vrot.slane %v648_v44, 6 }
0x1233   :  { %666 = vrot.lane.b32.xlu2 %v665_v17, %s896_s24 }
0x1237   :  { %v829_v46 = vpop.eup %828 }
0x1238   :  { %651 = vrot.lane.b32.xlu0 %v829_v46, %s894_s22 }
0x123b   :  { %722 = vrot.lane.b32.xlu2 %v601_v34, %s894_s22 }
0x1240   :  { %714 = vrot.lane.b32.xlu0 %v459_v38, %s895_s23 }
0x128d   :  { %v667_v48 = vpop.permute.xlu2 %666 }
0x128e   :  { %v669_v49 = vsel %vm655_vm5, %v667_v48, %v600_v22 }
0x128f   :  { %730 = vrot.lane.b32.xlu0 %v669_v49, %s895_s23 }
0x1295   :  { %v723_v4 = vpop.permute.xlu2 %722 }
0x12aa   :  { %v652_v50 = vpop.permute.xlu0 %651 }
0x12ab   :  { %v654_v52 = vmul.f32 %v652_v50, %v632_v37 }
0x12ad   :  { %v659_v53 = vrot.slane %v654_v52, 6 }
0x12af   :  { %660 = vrot.lane.b32.xlu1 %v659_v53, %s895_s23 }
0x12b2   :  { %v715_v1 = vpop.permute.xlu0 %714 }
0x12b7   :  { %718 = vrot.lane.b32.xlu1 %v532_v54, %s895_s23 }
0x12bf   :  { %702 = vrot.lane.b32.xlu1 %v1028_v13, %s895_s23 }
0x12c7   :  { %706 = vrot.lane.b32.xlu1 %v332_v33, %s894_s22 }
0x1301   :  { %v731_v7 = vpop.permute.xlu0 %730 }
0x1321   :  { %v661_v32 = vpop.permute.xlu1 %660 }
0x1322   :  { %v663_v58 = vsel %vm655_vm5, %v661_v32, %v594_v29  ;;  %v670_v13 = vsel %vm655_vm5, %v661_v32, 0.0 }
0x1323   :  { %726 = vrot.lane.b32.xlu2 %v670_v13, %s896_s24  ;;  %776 = vmatmul.msk.f32.vlgmr.msra.gmra.mxu3 %vm140_vm11, %v663_v58  ;;  %v745_v12 = vsel %vm140_vm11, %v663_v58, %v731_v7 }
0x1329   :  { %v719_v63 = vpop.permute.xlu1 %718 }
0x132a   :  { %v742_v8 = vsel %vm140_vm11, %v715_v1, %v719_v63 }
0x132b   :  { %710 = vrot.lane.b32.xlu2 %v401_v45, %s896_s24  ;;  %v743_v11 = vsel %vm738_vm6, %v742_v8, %v723_v4 }
0x1331   :  { %v703_v5 = vpop.permute.xlu1 %702 }
0x1332   :  { %v737_v0 = vsel %vm140_vm11, %v1006_v51, %v703_v5 }
0x1339   :  { %v707_v47 = vpop.permute.xlu1 %706 }
0x133a   :  { %v739_v10 = vsel %vm738_vm6, %v737_v0, %v707_v47 }
0x137d   :  { %v727_v6 = vpop.permute.xlu2 %726 }
0x137e   :  { %v744_v3 = vsel %vm740_vm7, %v743_v11, %v727_v6 }
0x137f   :  { %v751_v18 = vrot.slane %v744_v3, 6 }
0x1385   :  { %v711_v9 = vpop.permute.xlu2 %710 }
0x1386   :  { %v741_v15 = vsel %vm740_vm7, %v739_v10, %v711_v9 }
0x1387   :  { %v753_v21 = vsel %vm66_vm0, %v741_v15, %v751_v18 }
0x13a6   :  { %v697_v60 = vpop.f32.mrf.mxu3 }
0x13a7   :  { %v698_v61 = vadd.f32 %v797_v59, %v697_v60 }
0x13a9   :  { %830 = vtanh.f32 %v698_v61 }
0x13af   :  { %v831_v62 = vpop.eup %830 }
0x13b0   :  { %734 = vrot.lane.b32.xlu0 %v831_v62, %s894_s22 }
0x1422   :  { %v735_v14 = vpop.permute.xlu0 %734 }
0x1423   :  { %v746_v16 = vsel %vm738_vm6, %v745_v12, %v735_v14 }
0x1424   :  { %v747_v19 = vsel %vm740_vm7, %v746_v16, 0.0 }
0x1425   :  { %v752_v20 = vrot.slane %v747_v19, 4 }
0x1427   :  { %v754_v23 = vsel %vm68_vm1, %v753_v21, %v752_v20 }
0x1428   :  { %756 = vst [vmem:[%s1192_s2] sm:$0x3f] %v754_v23 }
0x1429   :  { %761 = vsyncpa [#allocation3], 1 }
0x142a   :  { %762 = vsyncpa [#allocation5], 1 }

</bundles_post_ra>
